<compile_context>
chip_gen: v6e
topology: v6e:2x2x1
jax: 0.10.0
libtpu: 0.0.40
codegen_flags: <defaults>
</compile_context>

<pallas_src>
import math
import functools

import numpy as np
import jax
import jax.numpy as jnp
from jax.experimental import pallas as pl
from jax.experimental.pallas import tpu as pltpu


# ---------------------------------------------------------------------------
# Fused RNBlock kernel (whole forward in one pallas_call, grid=())
# ---------------------------------------------------------------------------
def _rnblock_kernel(x_ref, y_ref, ex_ref, ey_ref, ext_ref,
                    w1y_ref, w1x_ref, b1_ref, w2_ref, b2_ref,
                    fw1_ref, fb1_ref, fw2_ref, fb2_ref,
                    o_ref, *, num_pairs):
    Xf = x_ref[...]                                   # (B*N, L)
    Yf = y_ref[...]                                   # (B*M, L)

    # --- RelationNetwork, first linear factored across the concat -----------
    # net(concat(Y[m], X[n])) = relu(Y[m]@W1y + X[n]@W1x + b1) @ W2 + b2
    Xa = jnp.dot(Xf, w1x_ref[...], preferred_element_type=jnp.float32)   # (B*N, H)
    Ya = jnp.dot(Yf, w1y_ref[...], preferred_element_type=jnp.float32)   # (B*M, H)

    # Pairwise pre-activations via one-hot pair-expansion matmuls (pure 2-D, MXU):
    #   Ex: (B*N*M, B*N) selects the X row of each pair, Ey selects the Y row.
    Hpre = (jnp.dot(ex_ref[...], Xa, preferred_element_type=jnp.float32)
            + jnp.dot(ey_ref[...], Ya, preferred_element_type=jnp.float32)
            + b1_ref[...])                            # (B*N*M, H)
    P = jnp.maximum(Hpre, 0.0)

    # Sum over the M pairs of each (b, n) query: Ex^T @ P  (sum as a matmul),
    # then apply the second linear once per query (linearity of the sum).
    S = jnp.dot(ext_ref[...], P, preferred_element_type=jnp.float32)     # (B*N, H)
    rn = (jnp.dot(S, w2_ref[...], preferred_element_type=jnp.float32)
          + float(num_pairs) * b2_ref[...])           # (B*N, L)

    Z = Xf + rn                                       # residual 1 (dropout = identity)

    # --- fc: Linear -> ReLU -> Linear, residual 2 ---------------------------
    H1 = jnp.maximum(
        jnp.dot(Z, fw1_ref[...], preferred_element_type=jnp.float32) + fb1_ref[...],
        0.0)
    Z = Z + jnp.dot(H1, fw2_ref[...], preferred_element_type=jnp.float32) + fb2_ref[...]

    o_ref[...] = Z                                    # (B*N, L)


# ---------------------------------------------------------------------------
# Host-side helpers
# ---------------------------------------------------------------------------
def _pair_expansion(B, N, M):
    """One-hot matrices mapping pair index p=(b,n,m) to its X row / Y row."""
    p = np.arange(B * N * M)
    x_idx = p // M                         # = b*N + n
    y_idx = (p // (N * M)) * M + (p % M)   # = b*M + m
    Ex = np.zeros((B * N * M, B * N), np.float32)
    Ey = np.zeros((B * N * M, B * M), np.float32)
    Ex[p, x_idx] = 1.0
    Ey[p, y_idx] = 1.0
    return jnp.asarray(Ex), jnp.asarray(Ey), jnp.asarray(np.ascontiguousarray(Ex.T))


def _linear_params(key, in_dim, out_dim):
    """nn.Linear default init; weight stored pre-transposed as (in, out)."""
    kw, kb = jax.random.split(key)
    bound = 1.0 / math.sqrt(in_dim)
    w = jax.random.uniform(kw, (in_dim, out_dim), jnp.float32, -bound, bound)
    b = jax.random.uniform(kb, (1, out_dim), jnp.float32, -bound, bound)
    return w, b


def init_rnblock_params(key, latent, hidden):
    k1, k2, k3, k4 = jax.random.split(key, 4)
    rn_w1, rn_b1 = _linear_params(k1, 2 * latent, hidden)   # pairs = concat(Y, X)
    rn_w2, rn_b2 = _linear_params(k2, hidden, latent)
    fc_w1, fc_b1 = _linear_params(k3, latent, hidden)
    fc_w2, fc_b2 = _linear_params(k4, hidden, latent)
    return dict(
        rn_w1y=rn_w1[:latent],              # first L input rows act on Y features
        rn_w1x=rn_w1[latent:],              # last  L input rows act on X features
        rn_b1=rn_b1, rn_w2=rn_w2, rn_b2=rn_b2,
        fc_w1=fc_w1, fc_b1=fc_b1, fc_w2=fc_w2, fc_b2=fc_b2)


def rnblock_forward(params, X, Y):
    """X: (B, N, L), Y: (B, M, L) -> (B, N, L). Whole RNBlock in one pallas_call."""
    B, N, L = X.shape
    M = Y.shape[1]
    Ex, Ey, ExT = _pair_expansion(B, N, M)
    Xf = X.reshape(B * N, L)
    Yf = Y.reshape(B * M, L)
    out = pl.pallas_call(
        functools.partial(_rnblock_kernel, num_pairs=M),
        out_shape=jax.ShapeDtypeStruct((B * N, L), jnp.float32),
        compiler_params=pltpu.CompilerParams(vmem_limit_bytes=32 << 20),
    )(Xf, Yf, Ex, Ey, ExT,
      params['rn_w1y'], params['rn_w1x'], params['rn_b1'],
      params['rn_w2'], params['rn_b2'],
      params['fc_w1'], params['fc_b1'],
      params['fc_w2'], params['fc_b2'])
    return out.reshape(B, N, L)


# ---------------------------------------------------------------------------
# Pure-JAX reference (literal transcription of the PyTorch forward)
# ---------------------------------------------------------------------------
def rnblock_reference(params, X, Y):
    B, N, L = X.shape
    M = Y.shape[1]
    rn_w1 = jnp.concatenate([params['rn_w1y'], params['rn_w1x']], axis=0)  # (2L, H)
    pairs = jnp.concatenate(
        [jnp.broadcast_to(Y[:, None, :, :], (B, N, M, L)),
         jnp.broadcast_to(X[:, :, None, :], (B, N, M, L))], axis=-1)       # (B,N,M,2L)
    h = jnp.maximum(pairs @ rn_w1 + params['rn_b1'], 0.0)
    z = h @ params['rn_w2'] + params['rn_b2']                              # (B,N,M,L)
    Z = X + jnp.sum(z, axis=2)                                             # pool='sum'
    h2 = jnp.maximum(Z @ params['fc_w1'] + params['fc_b1'], 0.0)
    return Z + h2 @ params['fc_w2'] + params['fc_b2']


# ---------------------------------------------------------------------------
if __name__ == "__main__":
    key = jax.random.PRNGKey(0)
    B, N, M = 2, 8, 8
    latent_size, hidden_size = 32, 32

    kp, kx, ky = jax.random.split(key, 3)
    params = init_rnblock_params(kp, latent_size, hidden_size)
    X = jax.random.normal(kx, (B, N, latent_size), jnp.float32)
    Y = jax.random.normal(ky, (B, M, latent_size), jnp.float32)

    out = rnblock_forward(params, X, Y)
    jax.block_until_ready(out)
    assert out.shape == (B, N, latent_size), out.shape

    ref = rnblock_reference(params, X, Y)
    max_err = float(jnp.max(jnp.abs(out - ref)))
    assert jnp.allclose(out, ref, atol=1e-3, rtol=1e-3), max_err

    print("KERNEL_OK")
</pallas_src>

<mosaic_0001>
module attributes {stable_mosaic.version = 11 : i64} {
  func.func @_rnblock_kernel(%arg0: memref<16x32xf32, #tpu.memory_space<vmem>>, %arg1: memref<16x32xf32, #tpu.memory_space<vmem>>, %arg2: memref<128x16xf32, #tpu.memory_space<vmem>>, %arg3: memref<128x16xf32, #tpu.memory_space<vmem>>, %arg4: memref<16x128xf32, #tpu.memory_space<vmem>>, %arg5: memref<32x32xf32, #tpu.memory_space<vmem>>, %arg6: memref<32x32xf32, #tpu.memory_space<vmem>>, %arg7: memref<1x32xf32, #tpu.memory_space<vmem>>, %arg8: memref<32x32xf32, #tpu.memory_space<vmem>>, %arg9: memref<1x32xf32, #tpu.memory_space<vmem>>, %arg10: memref<32x32xf32, #tpu.memory_space<vmem>>, %arg11: memref<1x32xf32, #tpu.memory_space<vmem>>, %arg12: memref<32x32xf32, #tpu.memory_space<vmem>>, %arg13: memref<1x32xf32, #tpu.memory_space<vmem>>, %arg14: memref<16x32xf32, #tpu.memory_space<vmem>>) attributes {dimension_semantics = [], scalar_prefetch = 0 : i64, scratch_operands = 0 : i64, tpu.core_type = #tpu.core_type<tc>} {
    %c0 = arith.constant 0 : index
    %c0_0 = arith.constant 0 : index
    %0 = vector.load %arg0[%c0, %c0_0] : memref<16x32xf32, #tpu.memory_space<vmem>>, vector<16x32xf32>
    %c0_1 = arith.constant 0 : index
    %c0_2 = arith.constant 0 : index
    %1 = vector.load %arg1[%c0_1, %c0_2] : memref<16x32xf32, #tpu.memory_space<vmem>>, vector<16x32xf32>
    %c0_3 = arith.constant 0 : index
    %c0_4 = arith.constant 0 : index
    %2 = vector.load %arg6[%c0_3, %c0_4] : memref<32x32xf32, #tpu.memory_space<vmem>>, vector<32x32xf32>
    %cst = arith.constant dense<0.000000e+00> : vector<16x32xf32>
    %3 = tpu.matmul %0, %2, %cst {dimension_numbers = #tpu.dot_dimension_numbers<[1], [0], [0], [1], [0, 0, 1, 1], [], []>} : vector<16x32xf32>, vector<32x32xf32>, vector<16x32xf32> -> vector<16x32xf32>
    %c0_5 = arith.constant 0 : index
    %c0_6 = arith.constant 0 : index
    %4 = vector.load %arg5[%c0_5, %c0_6] : memref<32x32xf32, #tpu.memory_space<vmem>>, vector<32x32xf32>
    %cst_7 = arith.constant dense<0.000000e+00> : vector<16x32xf32>
    %5 = tpu.matmul %1, %4, %cst_7 {dimension_numbers = #tpu.dot_dimension_numbers<[1], [0], [0], [1], [0, 0, 1, 1], [], []>} : vector<16x32xf32>, vector<32x32xf32>, vector<16x32xf32> -> vector<16x32xf32>
    %c0_8 = arith.constant 0 : index
    %c0_9 = arith.constant 0 : index
    %6 = vector.load %arg2[%c0_8, %c0_9] : memref<128x16xf32, #tpu.memory_space<vmem>>, vector<128x16xf32>
    %cst_10 = arith.constant dense<0.000000e+00> : vector<128x32xf32>
    %7 = tpu.matmul %6, %3, %cst_10 {dimension_numbers = #tpu.dot_dimension_numbers<[1], [0], [0], [1], [0, 0, 1, 1], [], []>} : vector<128x16xf32>, vector<16x32xf32>, vector<128x32xf32> -> vector<128x32xf32>
    %c0_11 = arith.constant 0 : index
    %c0_12 = arith.constant 0 : index
    %8 = vector.load %arg3[%c0_11, %c0_12] : memref<128x16xf32, #tpu.memory_space<vmem>>, vector<128x16xf32>
    %cst_13 = arith.constant dense<0.000000e+00> : vector<128x32xf32>
    %9 = tpu.matmul %8, %5, %cst_13 {dimension_numbers = #tpu.dot_dimension_numbers<[1], [0], [0], [1], [0, 0, 1, 1], [], []>} : vector<128x16xf32>, vector<16x32xf32>, vector<128x32xf32> -> vector<128x32xf32>
    %10 = arith.addf %7, %9 : vector<128x32xf32>
    %c0_14 = arith.constant 0 : index
    %c0_15 = arith.constant 0 : index
    %11 = vector.load %arg7[%c0_14, %c0_15] : memref<1x32xf32, #tpu.memory_space<vmem>>, vector<1x32xf32>
    %12 = vector.broadcast %11 : vector<1x32xf32> to vector<128x32xf32>
    %13 = arith.addf %10, %12 : vector<128x32xf32>
    %cst_16 = arith.constant 0.000000e+00 : f32
    %14 = vector.broadcast %cst_16 : f32 to vector<128x32xf32>
    %15 = arith.maximumf %13, %14 : vector<128x32xf32>
    %c0_17 = arith.constant 0 : index
    %c0_18 = arith.constant 0 : index
    %16 = vector.load %arg4[%c0_17, %c0_18] : memref<16x128xf32, #tpu.memory_space<vmem>>, vector<16x128xf32>
    %cst_19 = arith.constant dense<0.000000e+00> : vector<16x32xf32>
    %17 = tpu.matmul %16, %15, %cst_19 {dimension_numbers = #tpu.dot_dimension_numbers<[1], [0], [0], [1], [0, 0, 1, 1], [], []>} : vector<16x128xf32>, vector<128x32xf32>, vector<16x32xf32> -> vector<16x32xf32>
    %c0_20 = arith.constant 0 : index
    %c0_21 = arith.constant 0 : index
    %18 = vector.load %arg8[%c0_20, %c0_21] : memref<32x32xf32, #tpu.memory_space<vmem>>, vector<32x32xf32>
    %cst_22 = arith.constant dense<0.000000e+00> : vector<16x32xf32>
    %19 = tpu.matmul %17, %18, %cst_22 {dimension_numbers = #tpu.dot_dimension_numbers<[1], [0], [0], [1], [0, 0, 1, 1], [], []>} : vector<16x32xf32>, vector<32x32xf32>, vector<16x32xf32> -> vector<16x32xf32>
    %c0_23 = arith.constant 0 : index
    %c0_24 = arith.constant 0 : index
    %20 = vector.load %arg9[%c0_23, %c0_24] : memref<1x32xf32, #tpu.memory_space<vmem>>, vector<1x32xf32>
    %cst_25 = arith.constant 8.000000e+00 : f32
    %21 = vector.broadcast %cst_25 : f32 to vector<1x32xf32>
    %22 = arith.mulf %21, %20 : vector<1x32xf32>
    %23 = vector.broadcast %22 : vector<1x32xf32> to vector<16x32xf32>
    %24 = arith.addf %19, %23 : vector<16x32xf32>
    %25 = arith.addf %0, %24 : vector<16x32xf32>
    %c0_26 = arith.constant 0 : index
    %c0_27 = arith.constant 0 : index
    %26 = vector.load %arg10[%c0_26, %c0_27] : memref<32x32xf32, #tpu.memory_space<vmem>>, vector<32x32xf32>
    %cst_28 = arith.constant dense<0.000000e+00> : vector<16x32xf32>
    %27 = tpu.matmul %25, %26, %cst_28 {dimension_numbers = #tpu.dot_dimension_numbers<[1], [0], [0], [1], [0, 0, 1, 1], [], []>} : vector<16x32xf32>, vector<32x32xf32>, vector<16x32xf32> -> vector<16x32xf32>
    %c0_29 = arith.constant 0 : index
    %c0_30 = arith.constant 0 : index
    %28 = vector.load %arg11[%c0_29, %c0_30] : memref<1x32xf32, #tpu.memory_space<vmem>>, vector<1x32xf32>
    %29 = vector.broadcast %28 : vector<1x32xf32> to vector<16x32xf32>
    %30 = arith.addf %27, %29 : vector<16x32xf32>
    %cst_31 = arith.constant 0.000000e+00 : f32
    %31 = vector.broadcast %cst_31 : f32 to vector<16x32xf32>
    %32 = arith.maximumf %30, %31 : vector<16x32xf32>
    %c0_32 = arith.constant 0 : index
    %c0_33 = arith.constant 0 : index
    %33 = vector.load %arg12[%c0_32, %c0_33] : memref<32x32xf32, #tpu.memory_space<vmem>>, vector<32x32xf32>
    %cst_34 = arith.constant dense<0.000000e+00> : vector<16x32xf32>
    %34 = tpu.matmul %32, %33, %cst_34 {dimension_numbers = #tpu.dot_dimension_numbers<[1], [0], [0], [1], [0, 0, 1, 1], [], []>} : vector<16x32xf32>, vector<32x32xf32>, vector<16x32xf32> -> vector<16x32xf32>
    %35 = arith.addf %25, %34 : vector<16x32xf32>
    %c0_35 = arith.constant 0 : index
    %c0_36 = arith.constant 0 : index
    %36 = vector.load %arg13[%c0_35, %c0_36] : memref<1x32xf32, #tpu.memory_space<vmem>>, vector<1x32xf32>
    %37 = vector.broadcast %36 : vector<1x32xf32> to vector<16x32xf32>
    %38 = arith.addf %35, %37 : vector<16x32xf32>
    %c0_37 = arith.constant 0 : index
    %c0_38 = arith.constant 0 : index
    %39 = vector.load %arg14[%c0_37, %c0_38] : memref<16x32xf32, #tpu.memory_space<vmem>>, vector<16x32xf32>
    tpu.vector_store %arg14[%c0_37, %c0_38], %38 {strides = array<i32>} : memref<16x32xf32, #tpu.memory_space<vmem>>, vector<16x32xf32>,
    return
  }
}

</mosaic_0001>

<bundles_post_ra>
// kernel: tpu_custom_call.1
= control target key start
LH: loop header
LB: loop body
LE: loop exit
PB: predicated region body
PF: predicated region fallthrough
CT: control target
= control target key end

     0   :  { %s1722_s0 = inlined_call_operand.vmem [shape: f32[16,32], index: 0, kind: input, shape index: {}]   ;;  %s1723_s1 = inlined_call_operand.vmem [shape: f32[16,32], index: 1, kind: input, shape index: {}]   ;;  %s1724_s2 = inlined_call_operand.vmem [shape: f32[128,16], index: 2, kind: input, shape index: {}]   ;;  %s1725_s3 = inlined_call_operand.vmem [shape: f32[128,16], index: 3, kind: input, shape index: {}]   ;;  %s1726_s4 = inlined_call_operand.vmem [shape: f32[16,128], index: 4, kind: input, shape index: {}]   ;;  %s1727_s5 = inlined_call_operand.vmem [shape: f32[32,32], index: 5, kind: input, shape index: {}]   ;;  %s1728_s6 = inlined_call_operand.vmem [shape: f32[32,32], index: 6, kind: input, shape index: {}]   ;;  %s1729_s7 = inlined_call_operand.vmem [shape: f32[1,32], index: 7, kind: input, shape index: {}]   ;;  %s1730_s8 = inlined_call_operand.vmem [shape: f32[32,32], index: 8, kind: input, shape index: {}]   ;;  %s1731_s9 = inlined_call_operand.vmem [shape: f32[1,32], index: 9, kind: input, shape index: {}]   ;;  %s1732_s10 = inlined_call_operand.vmem [shape: f32[32,32], index: 10, kind: input, shape index: {}]   ;;  %s1733_s11 = inlined_call_operand.vmem [shape: f32[1,32], index: 11, kind: input, shape index: {}]   ;;  %s1734_s12 = inlined_call_operand.vmem [shape: f32[32,32], index: 12, kind: input, shape index: {}]   ;;  %s1735_s13 = inlined_call_operand.vmem [shape: f32[1,32], index: 13, kind: input, shape index: {}]   ;;  %s1736_s14 = inlined_call_operand.hbm [shape: f32[16,32], index: 14, kind: output, shape index: {}]  }
   0x1   :  { %v55_v0 = vld [vmem:[%s1728_s6 + $0x18] sm:$0xff]  ;;  %v54_v2 = vld [vmem:[%s1728_s6 + $0x10] sm:$0xff]  ;;  %v53_v4 = vld [vmem:[%s1728_s6 + $0x8] sm:$0xff] }
   0x2   :  { %v141_v1 = vld [vmem:[%s1727_s5 + $0x18] sm:$0xff]  ;;  %1190 = vmatprep.subr.mxu0 %v55_v0  ;;  %v140_v3 = vld [vmem:[%s1727_s5 + $0x10] sm:$0xff]  ;;  %v139_v5 = vld [vmem:[%s1727_s5 + $0x8] sm:$0xff] }
   0x3   :  { %1201 = vmatprep.subr.mxu1 %v141_v1  ;;  %1191 = vmatpush3.msra.mxu0 %v55_v0  ;;  %v52_v6 = vld [vmem:[%s1728_s6] sm:$0xff] }
   0x4   :  { %1202 = vmatpush3.msra.mxu1 %v141_v1  ;;  %1192 = vmatprep.subr.mxu0 %v54_v2  ;;  %v138_v7 = vld [vmem:[%s1727_s5] sm:$0xff] }
   0x5   :  { %1203 = vmatprep.subr.mxu1 %v140_v3  ;;  %1193 = vmatpush3.msra.mxu0 %v54_v2 }
   0x6   :  { %1204 = vmatpush3.msra.mxu1 %v140_v3 }
   0x7   :  { %19 = vsyncpa [#allocation3], 0  ;;  %1194 = vmatprep.subr.mxu0 %v53_v4  ;;  %1205 = vmatprep.subr.mxu1 %v139_v5  ;;  %v1466_v8 = vld [vmem:[%s1722_s0] sm:$0xff]  ;;  %vm56_vm0 = vcmask 261120   ;;  %v1474_v10 = vld [vmem:[%s1722_s0 + $0x8] sm:$0xff]  ;;  %vm255_vm1 = vcmask 130048  }
   0x8   :  { %1195 = vmatpush3.msra.mxu0 %v53_v4  ;;  %1206 = vmatpush3.msra.mxu1 %v139_v5  ;;  %v50_v9 = vld [vmem:[%s1723_s1] sm:$0xff]  ;;  %v51_v11 = vld [vmem:[%s1723_s1 + $0x8] sm:$0xff]  ;;  %v241_v20 = vld [vmem:[%s1725_s3 + $0x10] sm:$0xff] }
   0x9   :  { %1196 = vmatprep.subr.mxu0 %v52_v6  ;;  %1207 = vmatprep.subr.mxu1 %v138_v7  ;;  %v239_v12 = vld [vmem:[%s1725_s3] sm:$0xff]  ;;  %v240_v18 = vld [vmem:[%s1725_s3 + $0x8] sm:$0xff]  ;;  %v225_v21 = vld [vmem:[%s1724_s2 + $0x10] sm:$0xff] }
   0xa   :  { %1197 = vmatpush3.msra.mxu0 %v52_v6  ;;  %1198 = vmatprep.mubr.msk.f32.mxu0 %vm56_vm0, %v1466_v8  ;;  %v223_v13 = vld [vmem:[%s1724_s2] sm:$0xff]  ;;  %v224_v19 = vld [vmem:[%s1724_s2 + $0x8] sm:$0xff]  ;;  %v242_v22 = vld [vmem:[%s1725_s3 + $0x18] sm:$0xff] }
   0xb   :  { %1208 = vmatpush3.msra.mxu1 %v138_v7  ;;  %1209 = vmatprep.mubr.msk.f32.mxu1 %vm56_vm0, %v50_v9  ;;  %v226_v23 = vld [vmem:[%s1724_s2 + $0x18] sm:$0xff]  ;;  %v243_v24 = vld [vmem:[%s1725_s3 + $0x20] sm:$0xff]  ;;  %v244_v26 = vld [vmem:[%s1725_s3 + $0x28] sm:$0xff] }
   0xc   :  { %1199 = vmatmul.mubr.msk.f32.vlgmr.msra.gmra.mxu0 %vm56_vm0, %v1474_v10  ;;  %1210 = vmatmul.mubr.msk.f32.vlgmr.msra.gmra.mxu1 %vm56_vm0, %v51_v11  ;;  %v227_v25 = vld [vmem:[%s1724_s2 + $0x20] sm:$0xff]  ;;  %v228_v27 = vld [vmem:[%s1724_s2 + $0x28] sm:$0xff]  ;;  %v245_v28 = vld [vmem:[%s1725_s3 + $0x30] sm:$0xff] }
   0xd   :  { %1216 = vmatprep.mubr.msk.f32.mxu0 %vm255_vm1, %v239_v12  ;;  %1244 = vmatprep.mubr.msk.f32.mxu1 %vm255_vm1, %v223_v13  ;;  %v229_v29 = vld [vmem:[%s1724_s2 + $0x30] sm:$0xff]  ;;  %v246_v30 = vld [vmem:[%s1725_s3 + $0x38] sm:$0xff]  ;;  %v247_v32 = vld [vmem:[%s1725_s3 + $0x40] sm:$0xff] }
   0xe   :  { %v230_v31 = vld [vmem:[%s1724_s2 + $0x38] sm:$0xff]  ;;  %v231_v33 = vld [vmem:[%s1724_s2 + $0x40] sm:$0xff]  ;;  %v248_v34 = vld [vmem:[%s1725_s3 + $0x48] sm:$0xff] }
   0xf   :  { %v232_v35 = vld [vmem:[%s1724_s2 + $0x48] sm:$0xff]  ;;  %v249_v36 = vld [vmem:[%s1725_s3 + $0x50] sm:$0xff]  ;;  %v250_v38 = vld [vmem:[%s1725_s3 + $0x58] sm:$0xff] }
  0x10   :  { %v233_v37 = vld [vmem:[%s1724_s2 + $0x50] sm:$0xff]  ;;  %v234_v39 = vld [vmem:[%s1724_s2 + $0x58] sm:$0xff]  ;;  %v251_v40 = vld [vmem:[%s1725_s3 + $0x60] sm:$0xff] }
  0x11   :  { %v235_v41 = vld [vmem:[%s1724_s2 + $0x60] sm:$0xff]  ;;  %v252_v42 = vld [vmem:[%s1725_s3 + $0x68] sm:$0xff]  ;;  %v253_v44 = vld [vmem:[%s1725_s3 + $0x70] sm:$0xff] }
  0x12   :  { %v236_v43 = vld [vmem:[%s1724_s2 + $0x68] sm:$0xff]  ;;  %v237_v45 = vld [vmem:[%s1724_s2 + $0x70] sm:$0xff]  ;;  %v254_v46 = vld [vmem:[%s1725_s3 + $0x78] sm:$0xff] }
  0x13   :  { %v238_v47 = vld [vmem:[%s1724_s2 + $0x78] sm:$0xff]  ;;  %v681_v48 = vld [vmem:[%s1726_s4] sm:$0xff]  ;;  %v760_v50 = vld [vmem:[%s1730_s8 + $0x10] sm:$0xff] }
  0x14   :  { %v761_v49 = vld [vmem:[%s1730_s8 + $0x18] sm:$0xff]  ;;  %v759_v51 = vld [vmem:[%s1730_s8 + $0x8] sm:$0xff]  ;;  %v758_v52 = vld [vmem:[%s1730_s8] sm:$0xff] }
  0xcc   :  { %v1200_v14 = vpop.f32.mrf.mxu0  ;;  %v1211_v15 = vpop.f32.mrf.mxu1 }
  0xcd   :  { %1212 = vmatprep.subr.mxu0 %v1211_v15  ;;  %1240 = vmatprep.subr.mxu1 %v1200_v14 }
  0xce   :  { %v129_v16 = vpop.f32.mrf.mxu0  ;;  %v214_v17 = vpop.f32.mrf.mxu1  ;;  %1213 = vmatpush3.msra.mxu0 %v1211_v15  ;;  %1241 = vmatpush3.msra.mxu1 %v1200_v14 }
  0xcf   :  { %1214 = vmatprep.subr.mxu0 %v214_v17  ;;  %1242 = vmatprep.subr.mxu1 %v129_v16 }
  0xd0   :  { %1215 = vmatpush3.msra.mxu0 %v214_v17  ;;  %1243 = vmatpush3.msra.mxu1 %v129_v16 }
  0xd1   :  { %1217 = vmatmul.mubr.msk.f32.vlgmr.msra.gmra.mxu0 %vm255_vm1, %v240_v18  ;;  %1245 = vmatmul.mubr.msk.f32.vlgmr.msra.gmra.mxu1 %vm255_vm1, %v224_v19 }
  0xd2   :  { %1219 = vmatprep.mubr.msk.f32.mxu0 %vm255_vm1, %v241_v20  ;;  %1247 = vmatprep.mubr.msk.f32.mxu1 %vm255_vm1, %v225_v21 }
  0xd3   :  { %1303 = vmatprep.subr.mxu1 %v761_v49 }
  0xd4   :  { %1304 = vmatpush3.msra.mxu1 %v761_v49 }
  0xd5   :  { %1220 = vmatmul.mubr.msk.f32.gmra.mxu0 %vm255_vm1, %v242_v22  ;;  %1248 = vmatmul.mubr.msk.f32.gmra.mxu1 %vm255_vm1, %v226_v23  ;;  %v1647_v23 = vld [vmem:[%s1729_s7] ss:$0 sm:$0xff] }
  0xd6   :  { %1222 = vmatprep.mubr.msk.f32.mxu0 %vm255_vm1, %v243_v24  ;;  %1250 = vmatprep.mubr.msk.f32.mxu1 %vm255_vm1, %v227_v25 }
  0xd7   :  { %1305 = vmatprep.subr.mxu1 %v760_v50 }
  0xd8   :  { %1306 = vmatpush3.msra.mxu1 %v760_v50 }
  0xd9   :  { %1223 = vmatmul.mubr.msk.f32.gmra.mxu0 %vm255_vm1, %v244_v26  ;;  %1251 = vmatmul.mubr.msk.f32.gmra.mxu1 %vm255_vm1, %v228_v27 }
  0xda   :  { %1225 = vmatprep.mubr.msk.f32.mxu0 %vm255_vm1, %v245_v28  ;;  %1253 = vmatprep.mubr.msk.f32.mxu1 %vm255_vm1, %v229_v29 }
  0xdb   :  { %1307 = vmatprep.subr.mxu1 %v759_v51 }
  0xdc   :  { %1308 = vmatpush3.msra.mxu1 %v759_v51 }
  0xdd   :  { %1226 = vmatmul.mubr.msk.f32.gmra.mxu0 %vm255_vm1, %v246_v30  ;;  %1254 = vmatmul.mubr.msk.f32.gmra.mxu1 %vm255_vm1, %v230_v31 }
  0xde   :  { %1228 = vmatprep.mubr.msk.f32.mxu0 %vm255_vm1, %v247_v32  ;;  %1256 = vmatprep.mubr.msk.f32.mxu1 %vm255_vm1, %v231_v33 }
  0xdf   :  { %1309 = vmatprep.subr.mxu1 %v758_v52 }
  0xe0   :  { %1310 = vmatpush3.msra.mxu1 %v758_v52 }
  0xe1   :  { %1229 = vmatmul.mubr.msk.f32.gmra.mxu0 %vm255_vm1, %v248_v34  ;;  %1257 = vmatmul.mubr.msk.f32.gmra.mxu1 %vm255_vm1, %v232_v35 }
  0xe2   :  { %1231 = vmatprep.mubr.msk.f32.mxu0 %vm255_vm1, %v249_v36  ;;  %1259 = vmatprep.mubr.msk.f32.mxu1 %vm255_vm1, %v233_v37 }
  0xe5   :  { %1232 = vmatmul.mubr.msk.f32.gmra.mxu0 %vm255_vm1, %v250_v38  ;;  %1260 = vmatmul.mubr.msk.f32.gmra.mxu1 %vm255_vm1, %v234_v39 }
  0xe6   :  { %1234 = vmatprep.mubr.msk.f32.mxu0 %vm255_vm1, %v251_v40  ;;  %1262 = vmatprep.mubr.msk.f32.mxu1 %vm255_vm1, %v235_v41 }
  0xe9   :  { %1235 = vmatmul.mubr.msk.f32.gmra.mxu0 %vm255_vm1, %v252_v42  ;;  %1263 = vmatmul.mubr.msk.f32.gmra.mxu1 %vm255_vm1, %v236_v43 }
  0xea   :  { %1237 = vmatprep.mubr.msk.f32.mxu0 %vm255_vm1, %v253_v44  ;;  %1265 = vmatprep.mubr.msk.f32.mxu1 %vm255_vm1, %v237_v45 }
  0xed   :  { %1238 = vmatmul.mubr.msk.f32.gmra.mxu0 %vm255_vm1, %v254_v46  ;;  %1266 = vmatmul.mubr.msk.f32.gmra.mxu1 %vm255_vm1, %v238_v47 }
  0xee   :  { %1300 = vmatprep.mubr.f32.mxu0 %v681_v48 }
 0x191   :  { %v1628_v53 = vpop.f32.mrf.mxu0  ;;  %v1630_v54 = vpop.f32.mrf.mxu1 }
 0x193   :  { %v1632_v55 = vpop.f32.mrf.mxu0  ;;  %v1634_v56 = vpop.f32.mrf.mxu1 }
 0x195   :  { %v1636_v57 = vpop.f32.mrf.mxu0  ;;  %v1638_v58 = vpop.f32.mrf.mxu1 }
 0x197   :  { %v1640_v59 = vpop.f32.mrf.mxu0  ;;  %v1642_v60 = vpop.f32.mrf.mxu1 }
 0x199   :  { %v1224_v61 = vpop.f32.mrf.mxu0  ;;  %v1252_v62 = vpop.f32.mrf.mxu1 }
 0x19a   :  { %v589_v48 = vadd.f32 %v1252_v62, %v1224_v61  ;;  %v574_v61 = vadd.f32 %v1642_v60, %v1640_v59 }
 0x19b   :  { %v390_v63 = vpop.f32.mrf.mxu0  ;;  %v583_v0 = vpop.f32.mrf.mxu1 }
 0x19c   :  { %v584_v51 = vadd.f32 %v583_v0, %v390_v63  ;;  %v569_v63 = vadd.f32 %v1630_v54, %v1628_v53 }
 0x19d   :  { %v1227_v1 = vpop.f32.mrf.mxu0  ;;  %v1255_v2 = vpop.f32.mrf.mxu1 }
 0x19e   :  { %v599_v42 = vadd.f32 %v1255_v2, %v1227_v1  ;;  %v579_v2 = vadd.f32 %v1638_v58, %v1636_v57  ;;  %v653_v62 = vadd.f32 %v1647_v23, %v584_v51  ;;  %v564_v57 = vadd.f32 %v1634_v56, %v1632_v55  ;;  %v682_v55 = vld [vmem:[%s1726_s4 + $0x8] sm:$0xff] }
 0x19f   :  { %v400_v3 = vpop.f32.mrf.mxu0  ;;  %v593_v4 = vpop.f32.mrf.mxu1  ;;  %v651_v58 = vadd.f32 %v1647_v23, %v574_v61  ;;  %v650_v59 = vadd.f32 %v1647_v23, %v569_v63 }
 0x1a0   :  { %v594_v45 = vadd.f32 %v593_v4, %v400_v3  ;;  %v656_v49 = vadd.f32 %v1647_v23, %v599_v42  ;;  %v654_v3 = vadd.f32 %v1647_v23, %v589_v48  ;;  %v652_v0 = vadd.f32 %v1647_v23, %v579_v2 }
 0x1a1   :  { %v1230_v5 = vpop.f32.mrf.mxu0  ;;  %v1258_v6 = vpop.f32.mrf.mxu1  ;;  %v649_v53 = vadd.f32 %v1647_v23, %v564_v57  ;;  %v667_v54 = vmax.f32 %v651_v58, 0.0 }
 0x1a2   :  { %v609_v36 = vadd.f32 %v1258_v6, %v1230_v5  ;;  %v655_v52 = vadd.f32 %v1647_v23, %v594_v45  ;;  %v672_v4 = vmax.f32 %v656_v49, 0.0  ;;  %v670_v6 = vmax.f32 %v654_v3, 0.0 }
 0x1a3   :  { %v410_v7 = vpop.f32.mrf.mxu0  ;;  %v603_v9 = vpop.f32.mrf.mxu1  ;;  %v668_v60 = vmax.f32 %v652_v0, 0.0 }
 0x1a4   :  { %v604_v39 = vadd.f32 %v603_v9, %v410_v7  ;;  %v658_v43 = vadd.f32 %v1647_v23, %v609_v36  ;;  %v671_v5 = vmax.f32 %v655_v52, 0.0  ;;  %v669_v7 = vmax.f32 %v653_v62, 0.0 }
 0x1a5   :  { %v1233_v11 = vpop.f32.mrf.mxu0  ;;  %v1261_v12 = vpop.f32.mrf.mxu1  ;;  %v666_v9 = vmax.f32 %v650_v59, 0.0 }
 0x1a6   :  { %v619_v29 = vadd.f32 %v1261_v12, %v1233_v11  ;;  %v657_v46 = vadd.f32 %v1647_v23, %v604_v39  ;;  %v674_v50 = vmax.f32 %v658_v43, 0.0  ;;  %v665_v11 = vmax.f32 %v649_v53, 0.0  ;;  %v1105_v39 = vld [vmem:[%s1735_s13] ss:$0 sm:$0xff] }
 0x1a7   :  { %v420_v13 = vpop.f32.mrf.mxu0  ;;  %v613_v14 = vpop.f32.mrf.mxu1 }
 0x1a8   :  { %v614_v33 = vadd.f32 %v613_v14, %v420_v13  ;;  %v660_v37 = vadd.f32 %v1647_v23, %v619_v29  ;;  %v673_v1 = vmax.f32 %v657_v46, 0.0  ;;  %v856_v13 = vld [vmem:[%s1732_s10 + $0x18] sm:$0xff]  ;;  %v855_v14 = vld [vmem:[%s1732_s10 + $0x10] sm:$0xff] }
 0x1a9   :  { %v1236_v15 = vpop.f32.mrf.mxu0  ;;  %v1264_v16 = vpop.f32.mrf.mxu1  ;;  %v950_v29 = vld [vmem:[%s1734_s12 + $0x18] sm:$0xff] }
 0x1aa   :  { %v629_v21 = vadd.f32 %v1264_v16, %v1236_v15  ;;  %v659_v40 = vadd.f32 %v1647_v23, %v614_v33  ;;  %v676_v44 = vmax.f32 %v660_v37, 0.0  ;;  %v854_v15 = vld [vmem:[%s1732_s10 + $0x8] sm:$0xff]  ;;  %v853_v16 = vld [vmem:[%s1732_s10] sm:$0xff]  ;;  %1325 = vmatprep.subr.mxu1 %v950_v29 }
 0x1ab   :  { %v430_v17 = vpop.f32.mrf.mxu0  ;;  %v623_v18 = vpop.f32.mrf.mxu1 }
 0x1ac   :  { %v624_v26 = vadd.f32 %v623_v18, %v430_v17  ;;  %v662_v30 = vadd.f32 %v1647_v23, %v629_v21  ;;  %v675_v47 = vmax.f32 %v659_v40, 0.0  ;;  %v765_v17 = vlaneseq }
 0x1ad   :  { %v1239_v19 = vpop.f32.mrf.mxu0  ;;  %v1267_v20 = vpop.f32.mrf.mxu1 }
 0x1ae   :  { %v639_v22 = vadd.f32 %v1267_v20, %v1239_v19  ;;  %v661_v34 = vadd.f32 %v1647_v23, %v624_v26  ;;  %v678_v38 = vmax.f32 %v662_v30, 0.0  ;;  %v766_v18 = vshrl.u32 %v765_v17, 7  ;;  %v762_v19 = vld [vmem:[%s1731_s9] sm:$0x1]  ;;  %v949_v30 = vld [vmem:[%s1734_s12 + $0x10] sm:$0xff] }
 0x1af   :  { %v440_v24 = vpop.f32.mrf.mxu0  ;;  %v633_v25 = vpop.f32.mrf.mxu1  ;;  %v763_v20 = vmul.f32 8.0, %v762_v19 }
 0x1b0   :  { %v664_v27 = vadd.f32 %v1647_v23, %v639_v22  ;;  %v634_v28 = vadd.f32 %v633_v25, %v440_v24  ;;  %v677_v41 = vmax.f32 %v661_v34, 0.0  ;;  %v767_v21 = vsub.s32 0, %v766_v18 }
 0x1b2   :  { %v680_v31 = vmax.f32 %v664_v27, 0.0  ;;  %v663_v32 = vadd.f32 %v1647_v23, %v634_v28  ;;  %v768_v22 = vrot.slane %v763_v20, %v767_v21 }
 0x1b4   :  { %v679_v35 = vmax.f32 %v663_v32, 0.0  ;;  %1268 = vmatprep.subr.mxu0 %v680_v31 }
 0x1b5   :  { %1269 = vmatpush3.msra.mxu0 %v680_v31  ;;  %v1100_v31 = vld [vmem:[%s1733_s11] ss:$0 sm:$0xff] }
 0x1b6   :  { %1270 = vmatprep.subr.mxu0 %v679_v35 }
 0x1b7   :  { %1271 = vmatpush3.msra.mxu0 %v679_v35 }
 0x1b8   :  { %1272 = vmatprep.subr.mxu0 %v678_v38 }
 0x1b9   :  { %1273 = vmatpush3.msra.mxu0 %v678_v38 }
 0x1ba   :  { %1274 = vmatprep.subr.mxu0 %v677_v41 }
 0x1bb   :  { %1275 = vmatpush3.msra.mxu0 %v677_v41 }
 0x1bc   :  { %1276 = vmatprep.subr.mxu0 %v676_v44 }
 0x1bd   :  { %1277 = vmatpush3.msra.mxu0 %v676_v44 }
 0x1be   :  { %1278 = vmatprep.subr.mxu0 %v675_v47 }
 0x1bf   :  { %1279 = vmatpush3.msra.mxu0 %v675_v47 }
 0x1c0   :  { %1280 = vmatprep.subr.mxu0 %v674_v50 }
 0x1c1   :  { %1281 = vmatpush3.msra.mxu0 %v674_v50 }
 0x1c2   :  { %1282 = vmatprep.subr.mxu0 %v673_v1 }
 0x1c3   :  { %1283 = vmatpush3.msra.mxu0 %v673_v1 }
 0x1c4   :  { %1284 = vmatprep.subr.mxu0 %v672_v4 }
 0x1c5   :  { %1285 = vmatpush3.msra.mxu0 %v672_v4 }
 0x1c6   :  { %1286 = vmatprep.subr.mxu0 %v671_v5 }
 0x1c7   :  { %1287 = vmatpush3.msra.mxu0 %v671_v5 }
 0x1c8   :  { %1288 = vmatprep.subr.mxu0 %v670_v6 }
 0x1c9   :  { %1289 = vmatpush3.msra.mxu0 %v670_v6 }
 0x1ca   :  { %1290 = vmatprep.subr.mxu0 %v669_v7 }
 0x1cb   :  { %1291 = vmatpush3.msra.mxu0 %v669_v7 }
 0x1cc   :  { %1292 = vmatprep.subr.mxu0 %v668_v60 }
 0x1cd   :  { %1293 = vmatpush3.msra.mxu0 %v668_v60 }
 0x1ce   :  { %1294 = vmatprep.subr.mxu0 %v667_v54 }
 0x1cf   :  { %1295 = vmatpush3.msra.mxu0 %v667_v54 }
 0x1d0   :  { %1296 = vmatprep.subr.mxu0 %v666_v9 }
 0x1d1   :  { %1297 = vmatpush3.msra.mxu0 %v666_v9 }
 0x1d2   :  { %1298 = vmatprep.subr.mxu0 %v665_v11 }
 0x1d3   :  { %1299 = vmatpush3.msra.mxu0 %v665_v11 }
 0x1d4   :  { %1301 = vmatmul.mubr.f32.vlgmr.msra.gmra.mxu0 %v682_v55  ;;  %1314 = vmatprep.subr.mxu0 %v856_v13 }
 0x1d5   :  { %1315 = vmatpush3.msra.mxu0 %v856_v13 }
 0x1d6   :  { %1316 = vmatprep.subr.mxu0 %v855_v14 }
 0x1d7   :  { %1317 = vmatpush3.msra.mxu0 %v855_v14 }
 0x1d8   :  { %1318 = vmatprep.subr.mxu0 %v854_v15 }
 0x1d9   :  { %1319 = vmatpush3.msra.mxu0 %v854_v15 }
 0x1da   :  { %1320 = vmatprep.subr.mxu0 %v853_v16 }
 0x1db   :  { %1321 = vmatpush3.msra.mxu0 %v853_v16 }
 0x294   :  { %v1302_v56 = vpop.f32.mrf.mxu0 }
 0x296   :  { %v749_v12 = vpop.f32.mrf.mxu0 }
 0x297   :  { %1311 = vmatprep.mubr.msk.f32.mxu1 %vm56_vm0, %v749_v12 }
 0x298   :  { %1312 = vmatmul.mubr.msk.f32.vlgmr.msra.gmra.mxu1 %vm56_vm0, %v1302_v56 }
 0x299   :  { %1326 = vmatpush3.msra.mxu1 %v950_v29 }
 0x29a   :  { %1327 = vmatprep.subr.mxu1 %v949_v30 }
 0x29b   :  { %1328 = vmatpush3.msra.mxu1 %v949_v30 }
 0x358   :  { %v1313_v23 = vpop.f32.mrf.mxu1 }
 0x359   :  { %v848_v24 = vadd.f32 %v1313_v23, %v768_v22 }
 0x35a   :  { %v842_v25 = vpop.f32.mrf.mxu1 }
 0x35b   :  { %v843_v26 = vadd.f32 %v842_v25, %v768_v22  ;;  %v852_v28 = vadd.f32 %v848_v24, %v1474_v10  ;;  %v947_v10 = vld [vmem:[%s1734_s12] sm:$0xff] }
 0x35d   :  { %v851_v27 = vadd.f32 %v843_v26, %v1466_v8  ;;  %v948_v8 = vld [vmem:[%s1734_s12 + $0x8] sm:$0xff]  ;;  %s1361_s12 = smov [#allocation2]  }
 0x35e   :  { %1329 = vmatprep.subr.mxu1 %v948_v8  ;;  %s1050_s28 = sshll.u32 %s1361_s12, 4  ;;  %s1051_s28 = int_to_ptr.vmem [resolvable:$true] %s1050_s28 }
 0x35f   :  { %1322 = vmatprep.mubr.msk.f32.mxu0 %vm56_vm0, %v851_v27  ;;  %1330 = vmatpush3.msra.mxu1 %v948_v8  ;;  %s1339_s11 = scalar_lea.vmem %s1051_s28, 256  ;;  %p1344_p1 = scmp.lt.s32.totalorder %s1051_s28, %s1051_s28 }
 0x360   :  { %1323 = vmatmul.mubr.msk.f32.vlgmr.msra.gmra.mxu0 %vm56_vm0, %v852_v28  ;;  %1331 = vmatprep.subr.mxu1 %v947_v10  ;;  %p1340_p0 = scmp.ne.s32.totalorder %s1051_s28, %s1339_s11  ;;  %p1345_p2 = scmp.lt.s32.totalorder %s1339_s11, %s1339_s11 }
 0x361   :  { %1332 = vmatpush3.msra.mxu1 %v947_v10 }
 0x362   :  { %p1346_p3 = por %p1345_p2, %p1344_p1 }
 0x364   :  { %p1347_p4 = pnand %p1346_p3, %p1340_p0 }
 0x420   :  { %v1324_v32 = vpop.f32.mrf.mxu0 }
 0x421   :  { %v942_v33 = vadd.f32 %v1324_v32, %v1100_v31 }
 0x422   :  { %v936_v34 = vpop.f32.mrf.mxu0 }
 0x423   :  { %v937_v35 = vadd.f32 %v1100_v31, %v936_v34  ;;  %v946_v37 = vmax.f32 %v942_v33, 0.0 }
 0x425   :  { %v945_v36 = vmax.f32 %v937_v35, 0.0 }
 0x427   :  { %1333 = vmatprep.mubr.msk.f32.mxu1 %vm56_vm0, %v945_v36 }
 0x428   :  { %1334 = vmatmul.mubr.msk.f32.vlgmr.msra.gmra.mxu1 %vm56_vm0, %v946_v37 }
 0x4e8   :  { %v1335_v38 = vpop.f32.mrf.mxu1 }
 0x4e9   :  { %v1033_v40 = vadd.f32 %v1335_v38, %v852_v28 }
 0x4ea   :  { %v1023_v41 = vpop.f32.mrf.mxu1 }
 0x4eb   :  { %v1042_v42 = vadd.f32 %v1105_v39, %v1033_v40  ;;  %v1032_v43 = vadd.f32 %v1023_v41, %v851_v27 }
 0x4ed   :  { %1044 = vst.msk [vmem:[#allocation2 + $0x8] sm:$0xff] %vm56_vm0, %v1042_v42  ;;  %v1041_v44 = vadd.f32 %v1105_v39, %v1032_v43 }
 0x4ef   :  { %1043 = vst.msk [vmem:[#allocation2] sm:$0xff] %vm56_vm0, %v1041_v44 }
 0x4f0   :  { %1350 = shalt.err (!%p1347_p4)
}
 0x4f1   :  { %s1362_s13 = smov 128   ;;  %s1363_s8 = smov 8  }
 0x4f2   :  { %1056 = dma.vmem_to_hbm [thread:$0]  %s1051_s28, 256, %s1736_s14, [#allocation3], %s1362_s13, %s1362_s13, %s1363_s8  }
 0x4f3   :  { %1359 = dma.done.wait [#allocation3], 256  }
 0x4f4   :  { %1360 = vsyncadd [#allocation3], 4294967040 }
 0x4f5   :  { %1060 = vsyncpa [#allocation3], 1 }

</bundles_post_ra>
